<compile_context>
chip_gen: v6e
topology: v6e:2x2x1
jax: 0.10.0
libtpu: 0.0.40
codegen_flags: <defaults>
</compile_context>

<pallas_src>
import functools

import jax
import jax.numpy as jnp
from jax.experimental import pallas as pl
from jax.experimental.pallas import tpu as pltpu


# ----------------------------- helpers --------------------------------------


def _round_up(x, m):
    return ((x + m - 1) // m) * m


def _cdiv(a, b):
    return -(-a // b)


def _vmem_capacity_bytes():
    """Physical VMEM of the current chip; conservative 64 MiB (v7x) fallback."""
    try:
        info = pltpu.get_tpu_info()
        cap = getattr(info, "vmem_capacity_bytes", None)
        if cap:
            return int(cap)
    except Exception:
        pass
    return 64 * 1024 * 1024


def _chunk_candidates(d_ff_pad, max_tf=2048):
    """d_ff chunk widths: divisors of d_ff_pad, multiples of 128, <= max_tf.

    Preference order: multiples of 512 first (fills the 2x256x256 MXU on
    v6e/v7x), largest first within each class.
    """
    hi = min(d_ff_pad, max_tf)
    cands = [c for c in range(128, hi + 1, 128) if d_ff_pad % c == 0]
    if not cands:
        cands = [hi]
    cands.sort(key=lambda c: (c % 512 == 0, c), reverse=True)
    return cands


def _fits(tm, tf, resident, d_model, d_ff_pad, xbytes, wbytes, budget):
    """Conservative VMEM working-set estimate for one (tm, tf) configuration."""
    io = 4 * tm * d_model * xbytes            # x + out tiles, double-buffered
    acc = tm * d_model * 4                    # f32 accumulator scratch
    h = tm * tf * (4 + wbytes)                # hidden f32 h + downcast copy
    if resident:
        w = 2 * 2 * d_model * d_ff_pad * wbytes   # both weights, 2 buffers each
        b = 2 * (d_ff_pad + d_model) * wbytes
    else:
        w = 2 * 2 * d_model * tf * wbytes         # streamed chunks, double-buffered
        b = 2 * (tf + d_model) * wbytes
    return io + acc + h + w + b <= budget


def _select_config(M, d_model, d_ff, xbytes, wbytes, budget, tm_req=512):
    """Pick (tm, tf, d_ff_pad, resident) under the VMEM budget.

    Prefers weight residency, then the largest row tile (raises arithmetic
    intensity on the weight stream), then the largest 512-aligned d_ff chunk.
    """
    d_ff_pad = _round_up(d_ff, 128)
    tf_cands = _chunk_candidates(d_ff_pad)
    tm_start = max(8, min(_round_up(M, 8), _round_up(tm_req, 8)))
    for resident in (True, False):
        tm = tm_start
        while True:
            for tf in tf_cands:
                if _fits(tm, tf, resident, d_model, d_ff_pad, xbytes, wbytes,
                         budget):
                    return tm, tf, d_ff_pad, resident
            if tm <= 8:
                break
            tm = max(8, _round_up(tm // 2, 8))
    return 8, tf_cands[-1], d_ff_pad, False


# ------------------------------ kernel --------------------------------------


def _ffn_kernel(x_ref, w1t_ref, b1_ref, w2t_ref, b2_ref, o_ref, acc_ref,
                *, tf, resident):
    # x_ref:   (tm, d_model)            row tile (resident across k)
    # w1t_ref: (d_model, tf|d_ff_pad)   linear1 weight (pre-transposed)
    # b1_ref:  (1, tf|d_ff_pad)
    # w2t_ref: (tf|d_ff_pad, d_model)   linear2 weight (pre-transposed)
    # b2_ref:  (1, d_model)
    # acc_ref: (tm, d_model)            f32 accumulator scratch
    k = pl.program_id(1)

    @pl.when(k == 0)
    def _init():
        # Fold the second bias into the accumulator init (applied exactly once).
        acc_ref[...] = jnp.broadcast_to(
            b2_ref[...].astype(jnp.float32), acc_ref.shape)

    if resident:
        # Weights are fully VMEM-resident: slice the current d_ff chunk.
        off = pl.multiple_of(k * tf, tf)
        w1c = w1t_ref[:, pl.ds(off, tf)]
        b1c = b1_ref[:, pl.ds(off, tf)]
        w2c = w2t_ref[pl.ds(off, tf), :]
    else:
        # Weight chunks are streamed in by the BlockSpec pipeline.
        w1c = w1t_ref[...]
        b1c = b1_ref[...]
        w2c = w2t_ref[...]

    # linear1 chunk + bias + ReLU (MXU matmul in native dtype, f32 accumulate)
    h = jnp.dot(x_ref[...], w1c, preferred_element_type=jnp.float32)
    h = jnp.maximum(h + b1c.astype(jnp.float32), 0.0)

    # Dropout (eval mode) == identity.
    # TODO(synk): training-mode dropout mask via pltpu.prng_random_bits.

    # linear2 chunk, accumulated in f32
    acc_ref[...] += jnp.dot(h.astype(w2c.dtype), w2c,
                            preferred_element_type=jnp.float32)

    @pl.when(k == pl.num_programs(1) - 1)
    def _finalize():
        o_ref[...] = acc_ref[...].astype(o_ref.dtype)


# ------------------------------ wrapper -------------------------------------


def feed_forward_block(x, w1t, b1, w2t, b2, *, tm=None, tf=None, resident=None):
    """Position-wise FFN forward (eval-mode dropout).

    x:   (batch, seq, d_model)
    w1t: (d_model, d_ff)  = linear1.weight.T  (stored pre-transposed)
    b1:  (d_ff,)
    w2t: (d_ff, d_model)  = linear2.weight.T  (stored pre-transposed)
    b2:  (d_model,)
    tm / tf / resident: optional overrides for tuning and testing.
    """
    batch, seq, d_model = x.shape
    d_ff = w1t.shape[1]
    assert w1t.shape == (d_model, d_ff)
    assert w2t.shape == (d_ff, d_model)
    assert b1.shape == (d_ff,)
    assert b2.shape == (d_model,)

    xbytes = jnp.dtype(x.dtype).itemsize
    wbytes = jnp.dtype(w1t.dtype).itemsize

    cap = _vmem_capacity_bytes()
    budget = (cap * 3) // 4  # headroom under physical VMEM

    M = batch * seq
    tm_sel, tf_sel, d_ff_pad, res_sel = _select_config(
        M, d_model, d_ff, xbytes, wbytes, budget)

    # Optional explicit overrides.
    if resident is not None:
        res_sel = bool(resident)
    if tf is not None:
        tf_sel = int(tf)
        d_ff_pad = _round_up(d_ff, tf_sel)
    if tm is not None:
        tm_sel = max(8, _round_up(int(tm), 8))

    # Balance row tiles so zero-padding waste is at most one sublane (8 rows).
    n_tiles = max(1, _cdiv(M, tm_sel))
    if res_sel and n_tiles == 1 and M >= 16:
        # Keep both v7x TensorCores busy; free when weights are resident.
        n_tiles = 2
    tm_eff = _round_up(_cdiv(M, n_tiles), 8)
    M_pad = tm_eff * n_tiles

    # Flatten rows; zero-pad rows and d_ff as needed (zero pads are inert).
    xf = x.reshape(M, d_model)
    if M_pad != M:
        xf = jnp.pad(xf, ((0, M_pad - M), (0, 0)))
    if d_ff_pad != d_ff:
        w1t = jnp.pad(w1t, ((0, 0), (0, d_ff_pad - d_ff)))
        b1 = jnp.pad(b1, (0, d_ff_pad - d_ff))
        w2t = jnp.pad(w2t, ((0, d_ff_pad - d_ff), (0, 0)))
    b1r = b1.reshape(1, d_ff_pad)
    b2r = b2.reshape(1, d_model)

    grid = (M_pad // tm_eff, d_ff_pad // tf_sel)

    x_spec = pl.BlockSpec((tm_eff, d_model), lambda i, k: (i, 0))
    out_spec = pl.BlockSpec((tm_eff, d_model), lambda i, k: (i, 0))
    b2_spec = pl.BlockSpec((1, d_model), lambda i, k: (0, 0))
    if res_sel:
        # Constant index maps: weights DMA'd into VMEM once per call.
        w1_spec = pl.BlockSpec((d_model, d_ff_pad), lambda i, k: (0, 0))
        b1_spec = pl.BlockSpec((1, d_ff_pad), lambda i, k: (0, 0))
        w2_spec = pl.BlockSpec((d_ff_pad, d_model), lambda i, k: (0, 0))
    else:
        # Streamed tf-wide chunks (per grid step).
        w1_spec = pl.BlockSpec((d_model, tf_sel), lambda i, k: (0, k))
        b1_spec = pl.BlockSpec((1, tf_sel), lambda i, k: (0, k))
        w2_spec = pl.BlockSpec((tf_sel, d_model), lambda i, k: (k, 0))

    weight_bytes = (w1t.size + w2t.size) * wbytes
    bytes_accessed = (
        xf.size * xbytes                      # x read
        + M_pad * d_model * xbytes            # out write
        + weight_bytes * (1 if res_sel else grid[0])
        + (b1r.size + b2r.size) * wbytes)
    cost = pl.CostEstimate(flops=4 * M_pad * d_model * d_ff_pad,
                           transcendentals=0,
                           bytes_accessed=int(bytes_accessed))

    kernel = functools.partial(_ffn_kernel, tf=tf_sel, resident=res_sel)

    out = pl.pallas_call(
        kernel,
        out_shape=jax.ShapeDtypeStruct((M_pad, d_model), x.dtype),
        grid_spec=pltpu.PrefetchScalarGridSpec(
            num_scalar_prefetch=0,
            grid=grid,
            in_specs=[x_spec, w1_spec, b1_spec, w2_spec, b2_spec],
            out_specs=out_spec,
            scratch_shapes=[pltpu.VMEM((tm_eff, d_model), jnp.float32)],
        ),
        compiler_params=pltpu.CompilerParams(
            dimension_semantics=("parallel", "arbitrary"),
            vmem_limit_bytes=int(budget)),
        cost_estimate=cost,
    )(xf, w1t, b1r, w2t, b2r)

    if M_pad != M:
        out = out[:M]
    return out.reshape(batch, seq, d_model)


# ------------------------------- test ---------------------------------------


def _init_linear(key, out_features, in_features, dtype=jnp.float32):
    """Deterministic init mimicking torch.nn.Linear default U(-1/sqrt(fan_in), +)."""
    kw, kb = jax.random.split(key)
    bound = 1.0 / (in_features ** 0.5)
    w = jax.random.uniform(kw, (out_features, in_features), dtype,
                           minval=-bound, maxval=bound)
    b = jax.random.uniform(kb, (out_features,), dtype,
                           minval=-bound, maxval=bound)
    return w, b


def _reference(x, w1, b1, w2, b2):
    # eval-mode dropout == identity
    return jnp.maximum(x @ w1.T + b1, 0.0) @ w2.T + b2


if __name__ == "__main__":
    key = jax.random.PRNGKey(0)

    # ---- Check 1: auto-selected config (resident-weight path) ----
    batch, seq, d_model, d_ff = 2, 8, 128, 512
    kx, k1, k2, key = jax.random.split(key, 4)
    x = jax.random.normal(kx, (batch, seq, d_model), jnp.float32)
    w1, b1 = _init_linear(k1, d_ff, d_model)   # linear1: d_model -> d_ff
    w2, b2 = _init_linear(k2, d_model, d_ff)   # linear2: d_ff -> d_model
    w1t = jnp.asarray(w1.T)                    # (d_model, d_ff), one-time layout
    w2t = jnp.asarray(w2.T)                    # (d_ff, d_model)

    y = feed_forward_block(x, w1t, b1, w2t, b2)
    y = jax.block_until_ready(y)
    ref = _reference(x, w1, b1, w2, b2)
    assert y.shape == (batch, seq, d_model)
    assert jnp.allclose(y, ref, atol=1e-4, rtol=1e-4), "mismatch (resident path)"

    # ---- Check 2: forced streamed path + ragged shapes (row & d_ff padding) ----
    batch2, seq2, d_model2, d_ff2 = 1, 10, 128, 320
    kx2, k3, k4, key = jax.random.split(key, 4)
    x2 = jax.random.normal(kx2, (batch2, seq2, d_model2), jnp.float32)
    w1b, b1b = _init_linear(k3, d_ff2, d_model2)
    w2b, b2b = _init_linear(k4, d_model2, d_ff2)
    y2 = feed_forward_block(x2, jnp.asarray(w1b.T), b1b, jnp.asarray(w2b.T),
                            b2b, tm=8, tf=128, resident=False)
    y2 = jax.block_until_ready(y2)
    ref2 = _reference(x2, w1b, b1b, w2b, b2b)
    assert y2.shape == (batch2, seq2, d_model2)
    assert jnp.allclose(y2, ref2, atol=1e-4, rtol=1e-4), "mismatch (streamed path)"

    print("KERNEL_OK")
</pallas_src>

<mosaic_0001>
module attributes {stable_mosaic.version = 11 : i64} {
  func.func @_ffn_kernel(%arg0: i32, %arg1: i32, %arg2: memref<8x128xf32, #tpu.memory_space<vmem>>, %arg3: memref<128x512xf32, #tpu.memory_space<vmem>>, %arg4: memref<1x512xf32, #tpu.memory_space<vmem>>, %arg5: memref<512x128xf32, #tpu.memory_space<vmem>>, %arg6: memref<1x128xf32, #tpu.memory_space<vmem>>, %arg7: memref<8x128xf32, #tpu.memory_space<vmem>>, %arg8: memref<8x128xf32, #tpu.memory_space<vmem>>) attributes {dimension_semantics = [#tpu.dimension_semantics<parallel>, #tpu.dimension_semantics<arbitrary>], iteration_bounds = array<i64: 2, 1>, scalar_prefetch = 0 : i64, scratch_operands = 1 : i64, tpu.core_type = #tpu.core_type<tc>, window_params = [{transform_indices = @transform_0, window_bounds = array<i64: 8, 128>}, {pipeline_mode = #tpu.pipeline_mode<synchronous>, transform_indices = @transform_1, window_bounds = array<i64: 128, 512>}, {pipeline_mode = #tpu.pipeline_mode<synchronous>, transform_indices = @transform_2, window_bounds = array<i64: 1, 512>}, {pipeline_mode = #tpu.pipeline_mode<synchronous>, transform_indices = @transform_3, window_bounds = array<i64: 512, 128>}, {pipeline_mode = #tpu.pipeline_mode<synchronous>, transform_indices = @transform_4, window_bounds = array<i64: 1, 128>}, {transform_indices = @transform_5, window_bounds = array<i64: 8, 128>}]} {
    %c0_i32 = arith.constant 0 : i32
    %0 = arith.cmpi eq, %arg1, %c0_i32 : i32
    %1 = arith.extui %0 : i1 to i32
    %c0_i32_0 = arith.constant 0 : i32
    %2 = arith.cmpi ne, %1, %c0_i32_0 : i32
    scf.if %2 {
      %c0_13 = arith.constant 0 : index
      %c0_14 = arith.constant 0 : index
      %24 = vector.load %arg6[%c0_13, %c0_14] : memref<1x128xf32, #tpu.memory_space<vmem>>, vector<1x128xf32>
      %25 = vector.shape_cast %24 : vector<1x128xf32> to vector<1x128xf32>
      %26 = vector.broadcast %25 : vector<1x128xf32> to vector<8x128xf32>
      %c0_15 = arith.constant 0 : index
      %c0_16 = arith.constant 0 : index
      %27 = vector.load %arg8[%c0_15, %c0_16] : memref<8x128xf32, #tpu.memory_space<vmem>>, vector<8x128xf32>
      tpu.vector_store %arg8[%c0_15, %c0_16], %26 {strides = array<i32>} : memref<8x128xf32, #tpu.memory_space<vmem>>, vector<8x128xf32>,
    } else {
    }
    %c512_i32 = arith.constant 512 : i32
    %3 = arith.muli %arg1, %c512_i32 : i32
    %4 = tpu.assume_multiple %3, 512 : i32
    %c0 = arith.constant 0 : index
    %5 = arith.index_cast %4 : i32 to index
    %6 = vector.load %arg3[%c0, %5] : memref<128x512xf32, #tpu.memory_space<vmem>>, vector<128x512xf32>
    %c0_1 = arith.constant 0 : index
    %7 = arith.index_cast %4 : i32 to index
    %8 = vector.load %arg4[%c0_1, %7] : memref<1x512xf32, #tpu.memory_space<vmem>>, vector<1x512xf32>
    %9 = arith.index_cast %4 : i32 to index
    %c0_2 = arith.constant 0 : index
    %10 = vector.load %arg5[%9, %c0_2] : memref<512x128xf32, #tpu.memory_space<vmem>>, vector<512x128xf32>
    %c0_3 = arith.constant 0 : index
    %c0_4 = arith.constant 0 : index
    %11 = vector.load %arg2[%c0_3, %c0_4] : memref<8x128xf32, #tpu.memory_space<vmem>>, vector<8x128xf32>
    %cst = arith.constant dense<0.000000e+00> : vector<8x512xf32>
    %12 = tpu.matmul %11, %6, %cst {dimension_numbers = #tpu.dot_dimension_numbers<[1], [0], [0], [1], [0, 0, 1, 1], [], []>} : vector<8x128xf32>, vector<128x512xf32>, vector<8x512xf32> -> vector<8x512xf32>
    %13 = vector.broadcast %8 : vector<1x512xf32> to vector<8x512xf32>
    %14 = arith.addf %12, %13 : vector<8x512xf32>
    %cst_5 = arith.constant 0.000000e+00 : f32
    %15 = vector.broadcast %cst_5 : f32 to vector<8x512xf32>
    %16 = arith.maximumf %14, %15 : vector<8x512xf32>
    %c0_6 = arith.constant 0 : index
    %c0_7 = arith.constant 0 : index
    %17 = vector.load %arg8[%c0_6, %c0_7] : memref<8x128xf32, #tpu.memory_space<vmem>>, vector<8x128xf32>
    %cst_8 = arith.constant dense<0.000000e+00> : vector<8x128xf32>
    %18 = tpu.matmul %16, %10, %cst_8 {dimension_numbers = #tpu.dot_dimension_numbers<[1], [0], [0], [1], [0, 0, 1, 1], [], []>} : vector<8x512xf32>, vector<512x128xf32>, vector<8x128xf32> -> vector<8x128xf32>
    %19 = arith.addf %17, %18 : vector<8x128xf32>
    %c0_9 = arith.constant 0 : index
    %c0_10 = arith.constant 0 : index
    %20 = vector.load %arg8[%c0_9, %c0_10] : memref<8x128xf32, #tpu.memory_space<vmem>>, vector<8x128xf32>
    tpu.vector_store %arg8[%c0_9, %c0_10], %19 {strides = array<i32>} : memref<8x128xf32, #tpu.memory_space<vmem>>, vector<8x128xf32>,
    %c0_i32_11 = arith.constant 0 : i32
    %21 = arith.cmpi eq, %arg1, %c0_i32_11 : i32
    %22 = arith.extui %21 : i1 to i32
    %c0_i32_12 = arith.constant 0 : i32
    %23 = arith.cmpi ne, %22, %c0_i32_12 : i32
    scf.if %23 {
      %c0_13 = arith.constant 0 : index
      %c0_14 = arith.constant 0 : index
      %24 = vector.load %arg8[%c0_13, %c0_14] : memref<8x128xf32, #tpu.memory_space<vmem>>, vector<8x128xf32>
      %c0_15 = arith.constant 0 : index
      %c0_16 = arith.constant 0 : index
      %25 = vector.load %arg7[%c0_15, %c0_16] : memref<8x128xf32, #tpu.memory_space<vmem>>, vector<8x128xf32>
      tpu.vector_store %arg7[%c0_15, %c0_16], %24 {strides = array<i32>} : memref<8x128xf32, #tpu.memory_space<vmem>>, vector<8x128xf32>,
    } else {
    }
    return
  }
  func.func @transform_0(%arg0: i32, %arg1: i32) -> (i32, i32) {
    %c0_i32 = arith.constant 0 : i32
    %c0_i32_0 = arith.constant 0 : i32
    return %arg0, %c0_i32 : i32, i32
  }
  func.func @transform_1(%arg0: i32, %arg1: i32) -> (i32, i32) {
    %c0_i32 = arith.constant 0 : i32
    %c0_i32_0 = arith.constant 0 : i32
    %c0_i32_1 = arith.constant 0 : i32
    return %c0_i32, %c0_i32_0 : i32, i32
  }
  func.func @transform_2(%arg0: i32, %arg1: i32) -> (i32, i32) {
    %c0_i32 = arith.constant 0 : i32
    %c0_i32_0 = arith.constant 0 : i32
    %c0_i32_1 = arith.constant 0 : i32
    return %c0_i32, %c0_i32_0 : i32, i32
  }
  func.func @transform_3(%arg0: i32, %arg1: i32) -> (i32, i32) {
    %c0_i32 = arith.constant 0 : i32
    %c0_i32_0 = arith.constant 0 : i32
    %c0_i32_1 = arith.constant 0 : i32
    return %c0_i32, %c0_i32_0 : i32, i32
  }
  func.func @transform_4(%arg0: i32, %arg1: i32) -> (i32, i32) {
    %c0_i32 = arith.constant 0 : i32
    %c0_i32_0 = arith.constant 0 : i32
    %c0_i32_1 = arith.constant 0 : i32
    return %c0_i32, %c0_i32_0 : i32, i32
  }
  func.func @transform_5(%arg0: i32, %arg1: i32) -> (i32, i32) {
    %c0_i32 = arith.constant 0 : i32
    %c0_i32_0 = arith.constant 0 : i32
    return %arg0, %c0_i32 : i32, i32
  }
}

</mosaic_0001>

<bundles_post_ra>
// kernel: tpu_custom_call.1
= control target key start
LH: loop header
LB: loop body
LE: loop exit
PB: predicated region body
PF: predicated region fallthrough
CT: control target
= control target key end

     0   :  { %s1504_s0 = inlined_call_operand.hbm [shape: f32[16,128], index: 0, kind: input, shape index: {}]   ;;  %s1505_s1 = inlined_call_operand.hbm [shape: f32[128,512], index: 1, kind: input, shape index: {}]   ;;  %s1506_s2 = inlined_call_operand.hbm [shape: f32[1,512], index: 2, kind: input, shape index: {}]   ;;  %s1507_s3 = inlined_call_operand.hbm [shape: f32[512,128], index: 3, kind: input, shape index: {}]   ;;  %s1508_s4 = inlined_call_operand.vmem [shape: f32[1,128], index: 4, kind: input, shape index: {}]   ;;  %s1509_s5 = inlined_call_operand.hbm [shape: f32[16,128], index: 5, kind: output, shape index: {}]  }
   0x1   :  { %1514 = sst [smem:[#allocation16_spill]] %s1505_s1 }
   0x2   :  { %10 = vsyncpa [#allocation4], 0 }
   0x3   :  { %12 = vsyncpa [#allocation4 + $0x1], 0 }
   0x4   :  { %13 = vsyncpa [#allocation7], 0 }
   0x5   :  { %14 = vsyncpa [#allocation10], 0 }
   0x6   :  { %15 = vsyncpa [#allocation5], 0 }
   0x7   :  { %17 = vsyncpa [#allocation5 + $0x1], 0  ;;  %s1308_s18 = smov 0   ;;  %s1310_s19 = smov 0  }
   0x8   :  { %s1312_s20 = smov 0   ;;  %s1314_s21 = smov 0  }
   0x9   :  { %s1316_s22 = smov 0   ;;  %s1318_s23 = smov 0  }
   0xa LB: > { %s884_s24 = sadd.s32 4294967295, %s1266_s23   ;;  %s885_s25 = sadd.s32 4294967294, %s1266_s23   ;;  %s1266_s23 = sphi %s1318_s23, %s23_s23   ;;  %s1262_s22 = sphi %s1316_s22, %s1533_s22   ;;  %s1258_s21 = sphi %s1314_s21, %s1532_s21   ;;  %s1254_s20 = sphi %s1312_s20, %s1531_s20   ;;  %s1250_s19 = sphi %s1310_s19, %s1530_s19   ;;  %s1246_s18 = sphi %s1308_s18, %s1529_s18  }
   0xb   : > { %p55_p0 = scmp.ne.s32.totalorder %s1250_s19, %s1246_s18  ;;  %p1342_p1 = scmp.eq.s32.totalorder %s884_s24, 0 }
   0xc   : > { %p1346_p2 = scmp.eq.s32.totalorder %s884_s24, 1  ;;  %p169_p3 = scmp.eq.s32.totalorder %s885_s25, 1 }
   0xd   : > { %s1515_s26 = scalar_select %p1342_p1, 1, 0 }
   0xe   : > { %p1352_p4 = por %p1342_p1, %p55_p0  ;;  %p886_p5 = scmp.ge.s32.totalorder %s1266_s23, 1 }
   0xf   : > { %p1357_p6 = por %p169_p3, %p55_p0  ;;  %p176_p7 = scmp.lt.s32.totalorder %s1266_s23, 3 }
  0x10   : > { %s1517_s28 = scalar_select %p1352_p4, 1, 0 }
  0x11   : > { %s1518_s29 = scalar_select %p1357_p6, 1, 0 }
  0x12   : > { %p1362_p8 = pnand %p886_p5, %p176_p7  ;;  %s1268_s6 = smov [#allocation6]  }
  0x13   : > { %s188_s7 = sshll.u32 %s1268_s6, 4  ;;  %s1269_s9 = smov [#allocation8]   ;;  %s189_s7 = int_to_ptr.vmem [resolvable:$true] %s188_s7 }
  0x14   : > { %s1519_s30 = scalar_select %p1362_p8, 1, 0 }
  0x15   : > { %p990_p9 = pneg %p1362_p8  ;;  %s202_s10 = sshll.u32 %s1269_s9, 4  ;;  %s203_s10 = int_to_ptr.vmem [resolvable:$true] %s202_s10 }
  0x16   : > { %s1270_s11 = smov [#allocation9]   ;;  %s1083_s13 = scalar_lea.vmem %s189_s7, 8192 }
  0x17   : > { %p1371_p11 = pnand %p990_p9, %p1342_p1  ;;  %s212_s12 = sshll.u32 %s1270_s11, 4  ;;  %s213_s12 = int_to_ptr.vmem [resolvable:$true] %s212_s12 }
  0x18   : > { %p1084_p13 = scmp.ne.s32.totalorder %s189_s7, %s1083_s13  ;;  %p1091_p5 = scmp.lt.s32.totalorder %s189_s7, %s189_s7 }
  0x19   : > { %p1074_p12 = pneg %p1371_p11  ;;  %p1092_p7 = scmp.lt.s32.totalorder %s1083_s13, %s1083_s13 }
  0x1b   : > { %p1086_p0 = pnand %p1084_p13, %p1074_p12  ;;  %p1093_p9 = por %p1092_p7, %p1091_p5 }
  0x1d   : > { %p1087_p3 = pneg %p1086_p0 }
  0x1f   : > { %p1094_p10 = pnand %p1093_p9, %p1087_p3 }
  0x21   : > { %1097 = shalt.err (!%p1094_p10)
}
  0x22   : > { %s1271_s14 = smov 512   ;;  %s1272_s15 = smov 32  }
  0x23   : > { %s1521_s1 = sld [smem:[#allocation16_spill]]  ;;  %s1109_s24 = scalar_lea.vmem %s203_s10, 64 }
  0x24   : > { %p1110_p6 = scmp.ne.s32.totalorder %s203_s10, %s1109_s24  ;;  %p1117_p1 = scmp.lt.s32.totalorder %s203_s10, %s203_s10 }
  0x25   : > { %p1118_p4 = scmp.lt.s32.totalorder %s1109_s24, %s1109_s24 }
  0x26   : > { %p1112_p13 = pnand %p1110_p6, %p1074_p12 }
  0x27   : > { %p1119_p5 = por %p1118_p4, %p1117_p1 }
  0x28   : > { %p1113_p0 = pneg %p1112_p13 }
  0x29   : > { %993 = dma.hbm_to_vmem [thread:$0]  (!%p1371_p11), %s1521_s1, 8192, %s189_s7, [#allocation7], %s1271_s14, %s1271_s14, %s1272_s15  }
  0x2a   : > { %p1120_p3 = pnand %p1119_p5, %p1113_p0 }
  0x2c   : > { %1123 = shalt.err (!%p1120_p3)
}
  0x2d   : > { %996 = dma.hbm_to_vmem [thread:$0]  (!%p1371_p11), %s1506_s2, 64, %s203_s10, [#allocation7]  }
  0x2e   : > { %s1135_s7 = scalar_lea.vmem %s213_s12, 8192  ;;  %p1143_p9 = scmp.lt.s32.totalorder %s213_s12, %s213_s12 }
  0x2f   : > { %p1136_p10 = scmp.ne.s32.totalorder %s213_s12, %s1135_s7  ;;  %p1144_p13 = scmp.lt.s32.totalorder %s1135_s7, %s1135_s7 }
  0x31   : > { %p1138_p7 = pnand %p1136_p10, %p1074_p12  ;;  %p1145_p8 = por %p1144_p13, %p1143_p9 }
  0x33   : > { %p1139_p6 = pneg %p1138_p7 }
  0x35   : > { %p1146_p1 = pnand %p1145_p8, %p1139_p6 }
  0x37   : > { %1149 = shalt.err (!%p1146_p1)
}
  0x38   : > { %s1273_s9 = smov 128   ;;  %s1274_s10 = smov 8  }
  0x39   : > { %999 = dma.hbm_to_vmem [thread:$0]  (!%p1371_p11), %s1507_s3, 8192, %s213_s12, [#allocation10], %s1273_s9, %s1273_s9, %s1274_s10  }
  0x3a   : > { %s42_s14 = sadd.s32 1, %s1254_s20  ;;  %s35_s15 = sadd.s32 1, %s1262_s22 }
  0x3b   : > { %p49_p4 = scmp.ne.s32.totalorder %s1254_s20, %s1250_s19  ;;  %p37_p8 = scmp.ge.s32.totalorder %s35_s15, 2 }
  0x3c   : > { %p50_p12 = scmp.eq.s32.totalorder %s1266_s23, 0  ;;  %p1011_p5 = scmp.lt.s32.totalorder %s1266_s23, 2 }
  0x3d   : > { %p1408_p0 = por %p1346_p2, %p49_p4  ;;  %s1535_s15 = smov (%p37_p8, %s35_s15), 0 }
  0x3e   : > { %p51_p3 = por %p50_p12, %p49_p4  ;;  %s229_s8 = sand.u32 1, %s1254_s20  }
  0x3f   : > { %s39_s17 = ssub.s32 %s1262_s22, %s1535_s15  ;;  %s891_s12 = sshll.u32 %s229_s8, 3 }
  0x40   : > { %p40_p10 = scmp.eq.s32.totalorder %s39_s17, 0  ;;  %s892_s24 = sshll.u32 %s1262_s22, 7 }
  0x41   : > { %s238_s27 = scalar_lea.hbm %s1504_s0, %s892_s24  ;;  %s233_s9 = scalar_lea.vmem [#allocation3], %s891_s12 }
  0x42   : > { %s1420_s25 = scalar_select %p40_p10, %s1254_s20, %s42_s14  }
  0x43   : > { %s240_s10 = sshll.u32 %s233_s9, 4  ;;  %p1427_p2 = pnand %p1011_p5, %p51_p3  ;;  %s241_s10 = int_to_ptr.vmem [resolvable:$true] %s240_s10 }
  0x44   : > { %s230_s13 = scalar_lea.sflag [#allocation4], %s229_s8  ;;  %s1163_s17 = scalar_lea.vmem %s241_s10, 128 }
  0x45   : > { %p1152_p11 = pneg %p1427_p2  ;;  %p1164_p7 = scmp.ne.s32.totalorder %s241_s10, %s1163_s17 }
  0x46   : > { %s1275_s14 = smov [#allocation3]  }
  0x47   : > { %p1166_p6 = pnand %p1164_p7, %p1152_p11  ;;  %s1168_s1 = sshll.u32 %s1275_s14, 4  ;;  %s1169_s1 = int_to_ptr.vmem [resolvable:$false] %s1168_s1 }
  0x48   : > { %s1170_s24 = scalar_lea.vmem %s1169_s1, 256  ;;  %p1171_p13 = scmp.lt.s32.totalorder %s241_s10, %s1169_s1 }
  0x49   : > { %p1167_p9 = pneg %p1166_p6  ;;  %p1172_p1 = scmp.lt.s32.totalorder %s1170_s24, %s1163_s17 }
  0x4b   : > { %p1173_p4 = por %p1172_p1, %p1171_p13 }
  0x4d   : > { %p1174_p8 = pnand %p1173_p4, %p1167_p9 }
  0x4f   : > { %1177 = shalt.err (!%p1174_p8)
}
  0x50   : > { %1003 = dma.hbm_to_vmem [thread:$0]  (!%p1427_p2), %s238_s27, 128, %s241_s10, %s230_s13  }
  0x51   : > { %p1524_p12 = scmp.ne.s32.totalorder %s1519_s30, 0 }
  0x52   : > { %s1438_s8 = sand.u32 (!%p1524_p12), 1, %s1250_s19   ;;  %p1525_p5 = scmp.ne.s32.totalorder (!%p1524_p12), %s1517_s28, 0 }
  0x53   : > { %249 = sbr.rel (%p1524_p12) target bundleno = 542 (0x21e), region = 40  ;;  %s894_s12 = sshll.u32 (!%p1524_p12), %s1438_s8, 3 }
  0x54   : > { %s252_s6 = scalar_lea.sflag (!%p1524_p12), [#allocation4], %s1438_s8  ;;  %s1444_s1 = scalar_lea.vmem (!%p1524_p12), [#allocation3], %s894_s12 }
  0x58   : > { %1229 = dma.done.wait (%p1525_p5), %s252_s6, 128  }
  0x59   : > { %1231 = vsyncadd (%p1525_p5), %s252_s6, 4294967168  ;;  %p1526_p3 = scmp.ne.s32.totalorder %s1515_s26, 0 }
  0x5b   : > { %1233 = dma.done.wait (%p1526_p3), [#allocation7], 8256  }
  0x5c   : > { %1235 = vsyncadd (%p1526_p3), [#allocation7], 4294959040 }
  0x5d   : > { %1237 = dma.done.wait (%p1526_p3), [#allocation10], 8192  }
  0x5e   : > { %1239 = vsyncadd (%p1526_p3), [#allocation10], 4294959104  ;;  %v1276_v0 = vmov 0.0   ;;  %v372_v1 = vld [vmem:[#allocation6 + $0x1e8] sm:$0xff]  ;;  %v374_v2 = vld [vmem:[#allocation6 + $0x1f8] sm:$0xff]  ;;  %s901_s30 = sshll.u32 %s1258_s21, 7 }
  0x5f   : > { %528 = vmatprep.mubr.f32.mxu0 %v1276_v0  ;;  %599 = vmatprep.mubr.f32.mxu1 %v1276_v0  ;;  %v371_v3 = vld [vmem:[#allocation6 + $0x1e0] sm:$0xff]  ;;  %v373_v4 = vld [vmem:[#allocation6 + $0x1f0] sm:$0xff]  ;;  %v368_v5 = vld [vmem:[#allocation6 + $0x1c8] sm:$0xff]  ;;  %s293_s7 = scalar_lea.vmem [#allocation11], %s894_s12  ;;  %s770_s11 = scalar_lea.hbm %s1509_s5, %s901_s30 }
  0x60   : > { %464 = vmatprep.subr.mxu0 %v372_v1  ;;  %535 = vmatprep.subr.mxu1 %v374_v2  ;;  %v370_v6 = vld [vmem:[#allocation6 + $0x1d8] sm:$0xff]  ;;  %v367_v7 = vld [vmem:[#allocation6 + $0x1c0] sm:$0xff]  ;;  %v369_v8 = vld [vmem:[#allocation6 + $0x1d0] sm:$0xff]  ;;  %s772_s27 = sshll.u32 %s293_s7, 4  ;;  %s759_s13 = scalar_lea.sflag [#allocation5], %s1438_s8  ;;  %s773_s27 = int_to_ptr.vmem [resolvable:$true] %s772_s27 }
  0x61   : > { %465 = vmatpush1.msra.mxu0 %v371_v3  ;;  %536 = vmatpush1.msra.mxu1 %v373_v4  ;;  %v364_v9 = vld [vmem:[#allocation6 + $0x1a8] sm:$0xff]  ;;  %v366_v10 = vld [vmem:[#allocation6 + $0x1b8] sm:$0xff]  ;;  %v363_v11 = vld [vmem:[#allocation6 + $0x1a0] sm:$0xff]  ;;  %s1178_s17 = scalar_lea.vmem %s773_s27, 128  ;;  %s1277_s14 = smov [#allocation11]  }
  0x62   : > { %466 = vmatprep.subr.mxu0 %v368_v5  ;;  %537 = vmatprep.subr.mxu1 %v370_v6  ;;  %v365_v12 = vld [vmem:[#allocation6 + $0x1b0] sm:$0xff]  ;;  %v360_v13 = vld [vmem:[#allocation6 + $0x188] sm:$0xff]  ;;  %v362_v14 = vld [vmem:[#allocation6 + $0x198] sm:$0xff]  ;;  %p1179_p10 = scmp.ne.s32.totalorder %s773_s27, %s1178_s17  ;;  %s1182_s24 = sshll.u32 %s1277_s14, 4  ;;  %s1183_s24 = int_to_ptr.vmem [resolvable:$false] %s1182_s24 }
  0x63   : > { %467 = vmatpush1.msra.mxu0 %v367_v7  ;;  %538 = vmatpush1.msra.mxu1 %v369_v8  ;;  %v359_v15 = vld [vmem:[#allocation6 + $0x180] sm:$0xff]  ;;  %v361_v16 = vld [vmem:[#allocation6 + $0x190] sm:$0xff]  ;;  %v356_v17 = vld [vmem:[#allocation6 + $0x168] sm:$0xff]  ;;  %s1184_s21 = scalar_lea.vmem %s1183_s24, 256  ;;  %p1185_p7 = scmp.lt.s32.totalorder %s773_s27, %s1183_s24 }
  0x64   : > { %468 = vmatprep.subr.mxu0 %v364_v9  ;;  %539 = vmatprep.subr.mxu1 %v366_v10  ;;  %v358_v18 = vld [vmem:[#allocation6 + $0x178] sm:$0xff]  ;;  %v355_v19 = vld [vmem:[#allocation6 + $0x160] sm:$0xff]  ;;  %v357_v20 = vld [vmem:[#allocation6 + $0x170] sm:$0xff]  ;;  %p1180_p2 = pnand %p1179_p10, %p1408_p0  ;;  %p1186_p6 = scmp.lt.s32.totalorder %s1184_s21, %s1178_s17 }
  0x65   : > { %469 = vmatpush1.msra.mxu0 %v363_v11  ;;  %540 = vmatpush1.msra.mxu1 %v365_v12  ;;  %v352_v21 = vld [vmem:[#allocation6 + $0x148] sm:$0xff]  ;;  %v354_v22 = vld [vmem:[#allocation6 + $0x158] sm:$0xff]  ;;  %v351_v23 = vld [vmem:[#allocation6 + $0x140] sm:$0xff] }
  0x66   : > { %470 = vmatprep.subr.mxu0 %v360_v13  ;;  %541 = vmatprep.subr.mxu1 %v362_v14  ;;  %v353_v24 = vld [vmem:[#allocation6 + $0x150] sm:$0xff]  ;;  %v348_v25 = vld [vmem:[#allocation6 + $0x128] sm:$0xff]  ;;  %v350_v26 = vld [vmem:[#allocation6 + $0x138] sm:$0xff]  ;;  %p1181_p11 = pneg %p1180_p2  ;;  %p1187_p9 = por %p1186_p6, %p1185_p7 }
  0x67   : > { %471 = vmatpush1.msra.mxu0 %v359_v15  ;;  %542 = vmatpush1.msra.mxu1 %v361_v16  ;;  %v347_v27 = vld [vmem:[#allocation6 + $0x120] sm:$0xff]  ;;  %v349_v28 = vld [vmem:[#allocation6 + $0x130] sm:$0xff]  ;;  %v344_v29 = vld [vmem:[#allocation6 + $0x108] sm:$0xff] }
  0x68   : > { %472 = vmatprep.subr.mxu0 %v356_v17  ;;  %543 = vmatprep.subr.mxu1 %v358_v18  ;;  %v346_v30 = vld [vmem:[#allocation6 + $0x118] sm:$0xff]  ;;  %v343_v31 = vld [vmem:[#allocation6 + $0x100] sm:$0xff]  ;;  %v345_v32 = vld [vmem:[#allocation6 + $0x110] sm:$0xff]  ;;  %p1188_p13 = pnand %p1187_p9, %p1181_p11 }
  0x69   : > { %473 = vmatpush1.msra.mxu0 %v355_v19  ;;  %544 = vmatpush1.msra.mxu1 %v357_v20  ;;  %v340_v33 = vld [vmem:[#allocation6 + $0xe8] sm:$0xff]  ;;  %v342_v34 = vld [vmem:[#allocation6 + $0xf8] sm:$0xff]  ;;  %v339_v35 = vld [vmem:[#allocation6 + $0xe0] sm:$0xff] }
  0x6a   : > { %474 = vmatprep.subr.mxu0 %v352_v21  ;;  %545 = vmatprep.subr.mxu1 %v354_v22  ;;  %v341_v36 = vld [vmem:[#allocation6 + $0xf0] sm:$0xff]  ;;  %v336_v37 = vld [vmem:[#allocation6 + $0xc8] sm:$0xff]  ;;  %v338_v38 = vld [vmem:[#allocation6 + $0xd8] sm:$0xff] }
  0x6b   : > { %475 = vmatpush1.msra.mxu0 %v351_v23  ;;  %546 = vmatpush1.msra.mxu1 %v353_v24  ;;  %v335_v39 = vld [vmem:[#allocation6 + $0xc0] sm:$0xff]  ;;  %v337_v40 = vld [vmem:[#allocation6 + $0xd0] sm:$0xff]  ;;  %v332_v41 = vld [vmem:[#allocation6 + $0xa8] sm:$0xff] }
  0x6c   : > { %476 = vmatprep.subr.mxu0 %v348_v25  ;;  %547 = vmatprep.subr.mxu1 %v350_v26  ;;  %v334_v42 = vld [vmem:[#allocation6 + $0xb8] sm:$0xff]  ;;  %v331_v43 = vld [vmem:[#allocation6 + $0xa0] sm:$0xff]  ;;  %v333_v44 = vld [vmem:[#allocation6 + $0xb0] sm:$0xff] }
  0x6d   : > { %477 = vmatpush1.msra.mxu0 %v347_v27  ;;  %548 = vmatpush1.msra.mxu1 %v349_v28  ;;  %v328_v45 = vld [vmem:[#allocation6 + $0x88] sm:$0xff]  ;;  %v330_v46 = vld [vmem:[#allocation6 + $0x98] sm:$0xff]  ;;  %v327_v47 = vld [vmem:[#allocation6 + $0x80] sm:$0xff] }
  0x6e   : > { %478 = vmatprep.subr.mxu0 %v344_v29  ;;  %549 = vmatprep.subr.mxu1 %v346_v30  ;;  %v329_v48 = vld [vmem:[#allocation6 + $0x90] sm:$0xff]  ;;  %v324_v49 = vld [vmem:[#allocation6 + $0x68] sm:$0xff]  ;;  %v326_v50 = vld [vmem:[#allocation6 + $0x78] sm:$0xff] }
  0x6f   : > { %479 = vmatpush1.msra.mxu0 %v343_v31  ;;  %550 = vmatpush1.msra.mxu1 %v345_v32  ;;  %v323_v51 = vld [vmem:[#allocation6 + $0x60] sm:$0xff]  ;;  %v325_v52 = vld [vmem:[#allocation6 + $0x70] sm:$0xff]  ;;  %v320_v53 = vld [vmem:[#allocation6 + $0x48] sm:$0xff] }
  0x70   : > { %480 = vmatprep.subr.mxu0 %v340_v33  ;;  %551 = vmatprep.subr.mxu1 %v342_v34  ;;  %v322_v54 = vld [vmem:[#allocation6 + $0x58] sm:$0xff]  ;;  %v319_v55 = vld [vmem:[#allocation6 + $0x40] sm:$0xff]  ;;  %v321_v56 = vld [vmem:[#allocation6 + $0x50] sm:$0xff] }
  0x71   : > { %481 = vmatpush1.msra.mxu0 %v339_v35  ;;  %552 = vmatpush1.msra.mxu1 %v341_v36  ;;  %v316_v57 = vld [vmem:[#allocation6 + $0x28] sm:$0xff]  ;;  %v318_v58 = vld [vmem:[#allocation6 + $0x38] sm:$0xff]  ;;  %v315_v59 = vld [vmem:[#allocation6 + $0x20] sm:$0xff] }
  0x72   : > { %482 = vmatprep.subr.mxu0 %v336_v37  ;;  %553 = vmatprep.subr.mxu1 %v338_v38  ;;  %v317_v60 = vld [vmem:[#allocation6 + $0x30] sm:$0xff]  ;;  %v312_v61 = vld [vmem:[#allocation6 + $0x8] sm:$0xff]  ;;  %v314_v62 = vld [vmem:[#allocation6 + $0x18] sm:$0xff] }
  0x73   : > { %483 = vmatpush1.msra.mxu0 %v335_v39  ;;  %554 = vmatpush1.msra.mxu1 %v337_v40  ;;  %v311_v63 = vld [vmem:[#allocation6] sm:$0xff]  ;;  %v313_v0 = vld [vmem:[#allocation6 + $0x10] sm:$0xff] }
  0x74   : > { %484 = vmatprep.subr.mxu0 %v332_v41  ;;  %555 = vmatprep.subr.mxu1 %v334_v42  ;;  %v442_v1 = vld [vmem:[%s1444_s1] sm:$0xff]  ;;  %v406_v14 = vld [vmem:[#allocation9 + $0xe0] sm:$0xff] }
  0x75   : > { %485 = vmatpush1.msra.mxu0 %v331_v43  ;;  %556 = vmatpush1.msra.mxu1 %v333_v44  ;;  %v409_v2 = vld [vmem:[#allocation9 + $0xf8] sm:$0xff]  ;;  %v408_v6 = vld [vmem:[#allocation9 + $0xf0] sm:$0xff]  ;;  %v407_v10 = vld [vmem:[#allocation9 + $0xe8] sm:$0xff] }
  0x76   : > { %486 = vmatprep.subr.mxu0 %v328_v45  ;;  %557 = vmatprep.subr.mxu1 %v330_v46  ;;  %v441_v3 = vld [vmem:[#allocation9 + $0x1f8] sm:$0xff]  ;;  %v440_v7 = vld [vmem:[#allocation9 + $0x1f0] sm:$0xff]  ;;  %v439_v11 = vld [vmem:[#allocation9 + $0x1e8] sm:$0xff] }
  0x77   : > { %487 = vmatpush1.msra.mxu0 %v327_v47  ;;  %558 = vmatpush1.msra.mxu1 %v329_v48  ;;  %v393_v4 = vld [vmem:[#allocation9 + $0x78] sm:$0xff]  ;;  %v392_v8 = vld [vmem:[#allocation9 + $0x70] sm:$0xff]  ;;  %v391_v12 = vld [vmem:[#allocation9 + $0x68] sm:$0xff] }
  0x78   : > { %488 = vmatprep.subr.mxu0 %v324_v49  ;;  %559 = vmatprep.subr.mxu1 %v326_v50  ;;  %v425_v5 = vld [vmem:[#allocation9 + $0x178] sm:$0xff]  ;;  %v424_v9 = vld [vmem:[#allocation9 + $0x170] sm:$0xff]  ;;  %v423_v13 = vld [vmem:[#allocation9 + $0x168] sm:$0xff] }
  0x79   : > { %489 = vmatpush1.msra.mxu0 %v323_v51  ;;  %560 = vmatpush1.msra.mxu1 %v325_v52  ;;  %v438_v15 = vld [vmem:[#allocation9 + $0x1e0] sm:$0xff]  ;;  %v405_v18 = vld [vmem:[#allocation9 + $0xd8] sm:$0xff]  ;;  %v404_v22 = vld [vmem:[#allocation9 + $0xd0] sm:$0xff] }
  0x7a   : > { %490 = vmatprep.subr.mxu0 %v320_v53  ;;  %561 = vmatprep.subr.mxu1 %v322_v54  ;;  %v390_v16 = vld [vmem:[#allocation9 + $0x60] sm:$0xff]  ;;  %v437_v19 = vld [vmem:[#allocation9 + $0x1d8] sm:$0xff]  ;;  %v436_v23 = vld [vmem:[#allocation9 + $0x1d0] sm:$0xff] }
  0x7b   : > { %491 = vmatpush1.msra.mxu0 %v319_v55  ;;  %562 = vmatpush1.msra.mxu1 %v321_v56  ;;  %v422_v17 = vld [vmem:[#allocation9 + $0x160] sm:$0xff]  ;;  %v389_v20 = vld [vmem:[#allocation9 + $0x58] sm:$0xff]  ;;  %v388_v24 = vld [vmem:[#allocation9 + $0x50] sm:$0xff] }
  0x7c   : > { %492 = vmatprep.subr.mxu0 %v316_v57  ;;  %563 = vmatprep.subr.mxu1 %v318_v58  ;;  %v421_v21 = vld [vmem:[#allocation9 + $0x158] sm:$0xff]  ;;  %v420_v25 = vld [vmem:[#allocation9 + $0x150] sm:$0xff]  ;;  %v403_v26 = vld [vmem:[#allocation9 + $0xc8] sm:$0xff] }
  0x7d   : > { %493 = vmatpush1.msra.mxu0 %v315_v59  ;;  %564 = vmatpush1.msra.mxu1 %v317_v60  ;;  %v435_v27 = vld [vmem:[#allocation9 + $0x1c8] sm:$0xff]  ;;  %v402_v30 = vld [vmem:[#allocation9 + $0xc0] sm:$0xff]  ;;  %v401_v34 = vld [vmem:[#allocation9 + $0xb8] sm:$0xff] }
  0x7e   : > { %494 = vmatprep.subr.mxu0 %v312_v61  ;;  %565 = vmatprep.subr.mxu1 %v314_v62  ;;  %v387_v28 = vld [vmem:[#allocation9 + $0x48] sm:$0xff]  ;;  %v434_v31 = vld [vmem:[#allocation9 + $0x1c0] sm:$0xff]  ;;  %v433_v35 = vld [vmem:[#allocation9 + $0x1b8] sm:$0xff] }
  0x7f   : > { %495 = vmatpush1.msra.mxu0 %v311_v63  ;;  %566 = vmatpush1.msra.mxu1 %v313_v0  ;;  %v419_v29 = vld [vmem:[#allocation9 + $0x148] sm:$0xff]  ;;  %v386_v32 = vld [vmem:[#allocation9 + $0x40] sm:$0xff]  ;;  %v385_v36 = vld [vmem:[#allocation9 + $0x38] sm:$0xff] }
  0x80   : > { %529 = vmatmul.mubr.f32.vlgmr.msra.gmra.mxu0 %v442_v1  ;;  %600 = vmatmul.mubr.f32.vlgmr.msra.gmra.mxu1 %v442_v1  ;;  %v418_v33 = vld [vmem:[#allocation9 + $0x140] sm:$0xff]  ;;  %v417_v37 = vld [vmem:[#allocation9 + $0x138] sm:$0xff]  ;;  %v400_v38 = vld [vmem:[#allocation9 + $0xb0] sm:$0xff] }
  0x81   : > { %904 = vmatprep.subr.mxu0 %v409_v2  ;;  %939 = vmatprep.subr.mxu1 %v441_v3  ;;  %v432_v39 = vld [vmem:[#allocation9 + $0x1b0] sm:$0xff]  ;;  %v399_v42 = vld [vmem:[#allocation9 + $0xa8] sm:$0xff]  ;;  %v398_v46 = vld [vmem:[#allocation9 + $0xa0] sm:$0xff]  ;;  %v444_v2 = vlaneseq }
  0x82   : > { %905 = vmatpush3.msra.mxu0 %v393_v4  ;;  %940 = vmatpush3.msra.mxu1 %v425_v5  ;;  %v384_v40 = vld [vmem:[#allocation9 + $0x30] sm:$0xff]  ;;  %v431_v43 = vld [vmem:[#allocation9 + $0x1a8] sm:$0xff]  ;;  %v430_v47 = vld [vmem:[#allocation9 + $0x1a0] sm:$0xff] }
  0x83   : > { %906 = vmatprep.subr.mxu0 %v408_v6  ;;  %941 = vmatprep.subr.mxu1 %v440_v7  ;;  %v416_v41 = vld [vmem:[#allocation9 + $0x130] sm:$0xff]  ;;  %v383_v44 = vld [vmem:[#allocation9 + $0x28] sm:$0xff]  ;;  %v382_v48 = vld [vmem:[#allocation9 + $0x20] sm:$0xff]  ;;  %v445_v3 = vshrl.u32 %v444_v2, 7 }
  0x84   : > { %907 = vmatpush3.msra.mxu0 %v392_v8  ;;  %942 = vmatpush3.msra.mxu1 %v424_v9  ;;  %v415_v45 = vld [vmem:[#allocation9 + $0x128] sm:$0xff]  ;;  %v414_v49 = vld [vmem:[#allocation9 + $0x120] sm:$0xff]  ;;  %v397_v50 = vld [vmem:[#allocation9 + $0x98] sm:$0xff] }
  0x85   : > { %908 = vmatprep.subr.mxu0 %v407_v10  ;;  %943 = vmatprep.subr.mxu1 %v439_v11  ;;  %v429_v51 = vld [vmem:[#allocation9 + $0x198] sm:$0xff]  ;;  %v396_v54 = vld [vmem:[#allocation9 + $0x90] sm:$0xff]  ;;  %v395_v58 = vld [vmem:[#allocation9 + $0x88] sm:$0xff]  ;;  %v446_v4 = vsub.s32 0, %v445_v3  ;;  %v454_v5 = vsub.s32 2, %v445_v3  ;;  %v450_v7 = vsub.s32 1, %v445_v3 }
  0x86   : > { %909 = vmatpush3.msra.mxu0 %v391_v12  ;;  %944 = vmatpush3.msra.mxu1 %v423_v13  ;;  %v381_v52 = vld [vmem:[#allocation9 + $0x18] sm:$0xff]  ;;  %v428_v55 = vld [vmem:[#allocation9 + $0x190] sm:$0xff]  ;;  %v427_v59 = vld [vmem:[#allocation9 + $0x188] sm:$0xff]  ;;  %v458_v8 = vsub.s32 3, %v445_v3 }
  0x87   : > { %910 = vmatprep.subr.mxu0 %v406_v14  ;;  %945 = vmatprep.subr.mxu1 %v438_v15  ;;  %v413_v53 = vld [vmem:[#allocation9 + $0x118] sm:$0xff]  ;;  %v380_v56 = vld [vmem:[#allocation9 + $0x10] sm:$0xff]  ;;  %v379_v60 = vld [vmem:[#allocation9 + $0x8] sm:$0xff] }
  0x88   : > { %911 = vmatpush3.msra.mxu0 %v390_v16  ;;  %946 = vmatpush3.msra.mxu1 %v422_v17  ;;  %v412_v57 = vld [vmem:[#allocation9 + $0x110] sm:$0xff]  ;;  %v411_v61 = vld [vmem:[#allocation9 + $0x108] sm:$0xff]  ;;  %v394_v62 = vld [vmem:[#allocation9 + $0x80] sm:$0xff] }
  0x89   : > { %912 = vmatprep.subr.mxu0 %v405_v18  ;;  %947 = vmatprep.subr.mxu1 %v437_v19  ;;  %v426_v63 = vld [vmem:[#allocation9 + $0x180] sm:$0xff]  ;;  %v376_v6 = vld [vmem:[#allocation8] sm:$0xf] }
  0x8a   : > { %913 = vmatpush3.msra.mxu0 %v389_v20  ;;  %948 = vmatpush3.msra.mxu1 %v421_v21  ;;  %v378_v0 = vld [vmem:[#allocation9] sm:$0xff]  ;;  %v447_v9 = vrot.slane %v376_v6, %v446_v4  ;;  %v455_v10 = vrot.slane %v376_v6, %v454_v5  ;;  %v451_v11 = vrot.slane %v376_v6, %v450_v7 }
  0x8b   : > { %914 = vmatprep.subr.mxu0 %v404_v22  ;;  %949 = vmatprep.subr.mxu1 %v436_v23  ;;  %v410_v1 = vld [vmem:[#allocation9 + $0x100] sm:$0xff]  ;;  %v459_v12 = vrot.slane %v376_v6, %v458_v8 }
  0x8c   : > { %915 = vmatpush3.msra.mxu0 %v388_v24  ;;  %950 = vmatpush3.msra.mxu1 %v420_v25 }
  0x8d   : > { %916 = vmatprep.subr.mxu0 %v403_v26  ;;  %951 = vmatprep.subr.mxu1 %v435_v27 }
  0x8e   : > { %917 = vmatpush3.msra.mxu0 %v387_v28  ;;  %952 = vmatpush3.msra.mxu1 %v419_v29 }
  0x8f   : > { %918 = vmatprep.subr.mxu0 %v402_v30  ;;  %953 = vmatprep.subr.mxu1 %v434_v31  ;;  %v899_v31 = vld [vmem:[%s1508_s4] ss:$0 sm:$0xff] }
  0x90   : > { %919 = vmatpush3.msra.mxu0 %v386_v32  ;;  %954 = vmatpush3.msra.mxu1 %v418_v33 }
  0x91   : > { %920 = vmatprep.subr.mxu0 %v401_v34  ;;  %955 = vmatprep.subr.mxu1 %v433_v35 }
  0x92   : > { %921 = vmatpush3.msra.mxu0 %v385_v36  ;;  %956 = vmatpush3.msra.mxu1 %v417_v37 }
  0x93   : > { %922 = vmatprep.subr.mxu0 %v400_v38  ;;  %957 = vmatprep.subr.mxu1 %v432_v39 }
  0x94   : > { %923 = vmatpush3.msra.mxu0 %v384_v40  ;;  %958 = vmatpush3.msra.mxu1 %v416_v41 }
  0x95   : > { %924 = vmatprep.subr.mxu0 %v399_v42  ;;  %959 = vmatprep.subr.mxu1 %v431_v43 }
  0x96   : > { %925 = vmatpush3.msra.mxu0 %v383_v44  ;;  %960 = vmatpush3.msra.mxu1 %v415_v45 }
  0x97   : > { %926 = vmatprep.subr.mxu0 %v398_v46  ;;  %961 = vmatprep.subr.mxu1 %v430_v47 }
  0x98   : > { %927 = vmatpush3.msra.mxu0 %v382_v48  ;;  %962 = vmatpush3.msra.mxu1 %v414_v49 }
  0x99   : > { %928 = vmatprep.subr.mxu0 %v397_v50  ;;  %963 = vmatprep.subr.mxu1 %v429_v51 }
  0x9a   : > { %929 = vmatpush3.msra.mxu0 %v381_v52  ;;  %964 = vmatpush3.msra.mxu1 %v413_v53 }
  0x9b   : > { %930 = vmatprep.subr.mxu0 %v396_v54  ;;  %965 = vmatprep.subr.mxu1 %v428_v55 }
  0x9c   : > { %931 = vmatpush3.msra.mxu0 %v380_v56  ;;  %966 = vmatpush3.msra.mxu1 %v412_v57 }
  0x9d   : > { %932 = vmatprep.subr.mxu0 %v395_v58  ;;  %967 = vmatprep.subr.mxu1 %v427_v59 }
  0x9e   : > { %933 = vmatpush3.msra.mxu0 %v379_v60  ;;  %968 = vmatpush3.msra.mxu1 %v411_v61 }
  0x9f   : > { %934 = vmatprep.subr.mxu0 %v394_v62  ;;  %969 = vmatprep.subr.mxu1 %v426_v63 }
  0xa0   : > { %935 = vmatpush3.msra.mxu0 %v378_v0  ;;  %970 = vmatpush3.msra.mxu1 %v410_v1 }
 0x140   : > { %v530_v13 = vpop.f32.mrf.mxu0  ;;  %v601_v14 = vpop.f32.mrf.mxu1 }
 0x141   : > { %v531_v15 = vadd.f32 %v530_v13, %v447_v9  ;;  %v602_v16 = vadd.f32 %v601_v14, %v455_v10 }
 0x142   : > { %v532_v17 = vpop.f32.mrf.mxu0  ;;  %v603_v18 = vpop.f32.mrf.mxu1 }
 0x143   : > { %v533_v19 = vadd.f32 %v532_v17, %v451_v11  ;;  %v604_v20 = vadd.f32 %v603_v18, %v459_v12  ;;  %v606_v23 = vmax.f32 %v531_v15, 0.0  ;;  %v608_v24 = vmax.f32 %v602_v16, 0.0 }
 0x145   : > { %v607_v21 = vmax.f32 %v533_v19, 0.0  ;;  %v609_v22 = vmax.f32 %v604_v20, 0.0 }
 0x147   : > { %675 = vmatprep.mubr.f32.mxu0 %v607_v21  ;;  %745 = vmatprep.mubr.f32.mxu1 %v609_v22 }
 0x148   : > { %676 = vmatmul.mubr.f32.vlgmr.msra.gmra.mxu0 %v606_v23  ;;  %746 = vmatmul.mubr.f32.vlgmr.msra.gmra.mxu1 %v608_v24 }
 0x208   : > { %v936_v25 = vpop.f32.mrf.mxu0  ;;  %v971_v26 = vpop.f32.mrf.mxu1 }
 0x20a   : > { %v937_v27 = vpop.f32.mrf.mxu0  ;;  %v972_v28 = vpop.f32.mrf.mxu1 }
 0x20b   : > { %v938_v29 = vadd.f32 %v937_v27, %v936_v25  ;;  %v973_v30 = vadd.f32 %v972_v28, %v971_v26 }
 0x20d   : > { %v748_v32 = vadd.f32 %v973_v30, %v938_v29 }
 0x20f   : > { %v751_v33 = vadd.f32 %v899_v31, %v748_v32 }
 0x211   : > { %757 = vst [vmem:[%s293_s7] sm:$0xff] %v751_v33 }
 0x212   : > { %1191 = shalt.err (!%p1188_p13)
}
 0x213   : > { %s1192_s12 = scalar_lea.hbm %s770_s11, 128  ;;  %s1196_s1 = scalar_lea.hbm %s1509_s5, 256 }
 0x214   : > { %p1193_p1 = scmp.ne.s32.totalorder %s770_s11, %s1192_s12  ;;  %p1197_p12 = scmp.lt.s32.totalorder %s770_s11, %s1509_s5 }
 0x215   : > { %p1198_p5 = scmp.lt.s32.totalorder %s1196_s1, %s1192_s12 }
 0x216   : > { %p1194_p4 = pnand %p1193_p1, %p1408_p0 }
 0x217   : > { %p1199_p3 = por %p1198_p5, %p1197_p12 }
 0x218   : > { %p1195_p8 = pneg %p1194_p4 }
 0x21a   : > { %p1200_p10 = pnand %p1199_p3, %p1195_p8 }
 0x21c   : > { %1203 = shalt.err (!%p1200_p10)
}
 0x21d   : > { %988 = dma.vmem_to_hbm [thread:$0]  (%p1408_p0), %s773_s27, 128, %s770_s11, %s759_s13  }
 0x21e PF: > { %s784_s30 = sand.u32 1, %s1246_s18   ;;  %p1527_p2 = scmp.ne.s32.totalorder %s1518_s29, 0 }
 0x21f   : > { %p1528_p11 = scmp.ge.s32.totalorder %s1266_s23, 2  ;;  %s785_s7 = scalar_lea.sflag [#allocation5], %s784_s30 }
 0x221   : > { %p1005_p7 = pnand %p1528_p11, %p1527_p2 }
 0x223   : > { %p1006_p6 = pneg %p1005_p7 }
 0x225   : > { %1241 = dma.done.wait (%p1006_p6), %s785_s7, 128  }
 0x226   : > { %1243 = vsyncadd (%p1006_p6), %s785_s7, 4294967168  ;;  %s23_s23 = sadd.s32 1, %s1266_s23   ;;  %s1529_s18 = smov %s1250_s19 }
 0x227   : > { %p20_p9 = scmp.ge.s32.totalorder %s23_s23, 4   ;;  %s1530_s19 = smov %s1254_s20 }
 0x228   : > { %s1531_s20 = smov %s1420_s25  ;;  %s1532_s21 = smov %s1262_s22 }
 0x229   : > { %s1533_s22 = smov %s1535_s15  ;;  %22 = sbr.rel (!%p20_p9) target bundleno = 10 (0xa), region = 108 }
 0x22e   :  { %790 = vsyncpa [#allocation4], 1 }
 0x22f   :  { %792 = vsyncpa [#allocation4 + $0x1], 1 }
 0x230   :  { %793 = vsyncpa [#allocation7], 1 }
 0x231   :  { %794 = vsyncpa [#allocation10], 1 }
 0x232   :  { %795 = vsyncpa [#allocation5], 1 }
 0x233   :  { %797 = vsyncpa [#allocation5 + $0x1], 1 }

</bundles_post_ra>
